<compile_context>
chip_gen: v7x
topology: tpu7x:2x2x1
jax: 0.10.0
libtpu: 0.0.40
codegen_flags: <defaults>
</compile_context>

<pallas_src>
import functools

import jax
import jax.numpy as jnp
from jax.experimental import pallas as pl
from jax.experimental.pallas import tpu as pltpu


def _vmem_capacity_bytes():
    """Generation-aware VMEM capacity; conservative fallback = 64 MiB (v7x)."""
    try:
        info = pltpu.get_tpu_info()
        cap = getattr(info, "vmem_capacity_bytes", None)
        if cap:
            return int(cap)
    except Exception:
        pass
    return 64 * 1024 * 1024


def _dilated_conv1d_kernel(x_ref, w0_ref, w1_ref, b_ref, o_ref, carry_ref, *, tl, bn):
    # x_ref:     (bn, C, TL)  current time tile, NCL layout (time on lanes)
    # w0_ref:    (C, C)       tap 0 -> multiplies x[t - dilation]
    # w1_ref:    (C, C)       tap 1 -> multiplies x[t]
    # b_ref:     (C, 1)       f32 bias column (lane-broadcast)
    # o_ref:     (bn, C, TL)
    # carry_ref: (bn, C, d)   VMEM scratch: last `d` samples of the previous
    #                         time tile of the same batch block.
    j = pl.program_id(1)

    # First time tile of every batch block: causal history is zeros.  This
    # replaces nn.functional.pad(x, (dilation, 0)) with no HBM traffic.
    @pl.when(j == 0)
    def _():
        carry_ref[...] = jnp.zeros_like(carry_ref)

    x_cur = x_ref[...]                                          # (bn, C, TL)

    # Sliding history window: [carry | x_cur] covers x[j*TL - d : j*TL + TL].
    # (Handles d > TL as well; secondary relayout cost per the review — the
    # kernel is HBM-bound, revisit only if the XLU/vst slot ever saturates.)
    hist = jnp.concatenate([carry_ref[...], x_cur], axis=-1)    # (bn, C, d+TL)
    x_prev = hist[..., :tl]                                     # x[t - d]
    carry_ref[...] = hist[..., tl:]                             # last d cols -> next tile

    w0 = w0_ref[...]
    w1 = w1_ref[...]
    b = b_ref[...]                                              # (C, 1) f32

    # y = W0 @ x_prev + W1 @ x_cur + b, f32 accumulation.  bn is tiny (1..8):
    # static unroll keeps each matmul a plain (C,C)@(C,TL) MXU dot.
    for i in range(bn):
        y = jnp.dot(w0, x_prev[i], preferred_element_type=jnp.float32)
        y = y + jnp.dot(w1, x_cur[i], preferred_element_type=jnp.float32)
        y = y + b
        o_ref[i] = y.astype(o_ref.dtype)


def dilated_conv1d(x_ncl, weight, bias, dilation, keep_dim=True,
                   time_block=None, compute_dtype=None):
    """Causal dilated conv1d, kernel_size=2, stride=1 (matches DilatedConv1D).

    Args:
      x_ncl:  (N, C, L) — PyTorch NCL layout (no pads/transposes in HBM).
      weight: (C, C, 2) — nn.Conv1d weight (out, in, k).
      bias:   (C,)
      dilation: int >= 1.
      keep_dim: if True, causal left-pad so output length == L.
      time_block: optional time-tile override (rounded down to a multiple of
        128); default = largest tile fitting the VMEM budget.
      compute_dtype: optional dtype for x/W/y at the call boundary (e.g.
        jnp.bfloat16 halves HBM traffic); accumulation is always f32.
    """
    N, C, L = x_ncl.shape
    d = int(dilation)
    assert d >= 1
    if not keep_dim:
        assert L > d, "keep_dim=False requires L > dilation"

    cd = jnp.dtype(compute_dtype) if compute_dtype is not None else jnp.dtype(x_ncl.dtype)
    itemsize = cd.itemsize

    # Batch packing: fill the sublane dim (C=4 -> bn=2 so bn*C = 8 sublanes)
    # and halve the number of grid steps.
    bn = min(N, max(1, 8 // max(C, 1)))
    nb = pl.cdiv(N, bn)

    # Generation-aware time tile: ~4 pipelined blocks (2x in + 2x out) should
    # use ~40% of VMEM, leaving headroom for residents / compiler scratch.
    vmem_cap = _vmem_capacity_bytes()
    block_budget = max(2 * 1024 * 1024, int(vmem_cap * 0.40))
    per_block = block_budget // 4
    max_tl = max(128, (per_block // (bn * C * itemsize)) // 128 * 128)

    if time_block is None:
        tb = max_tl
    else:
        tb = max(128, (min(int(time_block), max_tl) // 128) * 128)

    if L <= tb:
        tl, t_tiles = L, 1
    else:
        tl, t_tiles = tb, pl.cdiv(L, tb)

    x_in = x_ncl.astype(cd)
    w0 = weight[:, :, 0].astype(cd)          # (C, C): multiplies x[t - d]
    w1 = weight[:, :, 1].astype(cd)          # (C, C): multiplies x[t]
    b_col = bias.reshape(C, 1).astype(jnp.float32)

    block_bytes = bn * C * tl * itemsize
    vmem_limit = int(min(vmem_cap, 4 * block_bytes + 8 * 1024 * 1024))

    kernel = functools.partial(_dilated_conv1d_kernel, tl=tl, bn=bn)

    out = pl.pallas_call(
        kernel,
        out_shape=jax.ShapeDtypeStruct((N, C, L), cd),
        grid_spec=pltpu.PrefetchScalarGridSpec(
            num_scalar_prefetch=0,
            grid=(nb, t_tiles),                                     # batch-blocks x time-tiles
            in_specs=[
                pl.BlockSpec((bn, C, tl), lambda n, j: (n, 0, j)),  # x tile
                pl.BlockSpec((C, C), lambda n, j: (0, 0)),          # W0 (resident)
                pl.BlockSpec((C, C), lambda n, j: (0, 0)),          # W1 (resident)
                pl.BlockSpec((C, 1), lambda n, j: (0, 0)),          # bias (resident)
            ],
            out_specs=pl.BlockSpec((bn, C, tl), lambda n, j: (n, 0, j)),
            scratch_shapes=[pltpu.VMEM((bn, C, d), cd)],            # causal carry
        ),
        compiler_params=pltpu.CompilerParams(
            # Time axis carries the causal history sequentially -> "arbitrary";
            # batch axis is parallel (megacore sharding where available).
            dimension_semantics=("parallel", "arbitrary"),
            vmem_limit_bytes=vmem_limit,
        ),
    )(x_in, w0, w1, b_col)

    if keep_dim:
        return out
    # keep_dim=False == "valid" (un-padded) conv == drop the first `d` frames.
    return out[:, :, d:]


def _reference(x_ncl, weight, bias, dilation, keep_dim=True):
    """Pure-JAX reference via lax.conv_general_dilated (matches nn.Conv1d)."""
    if keep_dim:
        x_ncl = jnp.pad(x_ncl, ((0, 0), (0, 0), (dilation, 0)))
    y = jax.lax.conv_general_dilated(
        x_ncl, weight,
        window_strides=(1,), padding="VALID",
        rhs_dilation=(dilation,),
        dimension_numbers=("NCH", "OIH", "NCH"))
    return y + bias.reshape(1, -1, 1)


if __name__ == "__main__":
    key = jax.random.PRNGKey(0)
    kx, kw, kb, kx2, kx3 = jax.random.split(key, 5)

    # Small config consistent with the module: batch=2, dim=4, L=16, dilation=2.
    N, C, L, d = 2, 4, 16, 2
    x = jax.random.normal(kx, (N, C, L), dtype=jnp.float32)
    weight = jax.random.normal(kw, (C, C, 2), dtype=jnp.float32) * 0.1
    bias = jax.random.normal(kb, (C,), dtype=jnp.float32) * 0.1

    out = jax.block_until_ready(dilated_conv1d(x, weight, bias, d, keep_dim=True))
    ref = _reference(x, weight, bias, d, keep_dim=True)
    assert out.shape == (N, C, L), out.shape
    assert jnp.allclose(out, ref, atol=1e-5, rtol=1e-5), "mismatch vs reference conv"

    # keep_dim=False ("valid" conv) path.
    out_nk = jax.block_until_ready(dilated_conv1d(x, weight, bias, d, keep_dim=False))
    ref_nk = _reference(x, weight, bias, d, keep_dim=False)
    assert out_nk.shape == (N, C, L - d), out_nk.shape
    assert jnp.allclose(out_nk, ref_nk, atol=1e-5, rtol=1e-5), "mismatch keep_dim=False"

    # Exercise the tiled path with partial time tile AND partial batch block
    # (multi-tile grid + cross-tile causal carry + OOB masking).
    N2, L2, d2 = 3, 1000, 5
    x2 = jax.random.normal(kx2, (N2, C, L2), dtype=jnp.float32)
    out2 = jax.block_until_ready(
        dilated_conv1d(x2, weight, bias, d2, keep_dim=True, time_block=256))
    ref2 = _reference(x2, weight, bias, d2, keep_dim=True)
    assert out2.shape == (N2, C, L2), out2.shape
    assert jnp.allclose(out2, ref2, atol=1e-4, rtol=1e-4), "mismatch on tiled path"

    # bf16 call-boundary path (halved HBM traffic, f32 accumulation) — loose check.
    N3, L3, d3 = 2, 2048, 4
    x3 = jax.random.normal(kx3, (N3, C, L3), dtype=jnp.float32)
    out3 = jax.block_until_ready(
        dilated_conv1d(x3, weight, bias, d3, keep_dim=True,
                       time_block=512, compute_dtype=jnp.bfloat16))
    ref3 = _reference(x3, weight, bias, d3, keep_dim=True)
    assert out3.shape == (N3, C, L3), out3.shape
    assert jnp.allclose(out3.astype(jnp.float32), ref3, atol=3e-2, rtol=3e-2), \
        "mismatch on bf16 path"

    print("KERNEL_OK")
</pallas_src>

<mosaic_0001>
module attributes {stable_mosaic.version = 11 : i64} {
  func.func @_dilated_conv1d_kernel(%arg0: i32, %arg1: i32, %arg2: memref<2x4x16xf32, #tpu.memory_space<vmem>>, %arg3: memref<4x4xf32, #tpu.memory_space<vmem>>, %arg4: memref<4x4xf32, #tpu.memory_space<vmem>>, %arg5: memref<4x1xf32, #tpu.memory_space<vmem>>, %arg6: memref<2x4x16xf32, #tpu.memory_space<vmem>>, %arg7: memref<2x4x2xf32, #tpu.memory_space<vmem>>) attributes {dimension_semantics = [#tpu.dimension_semantics<parallel>, #tpu.dimension_semantics<arbitrary>], iteration_bounds = array<i64: 1, 1>, scalar_prefetch = 0 : i64, scratch_operands = 1 : i64, tpu.core_type = #tpu.core_type<tc>, window_params = [{transform_indices = @transform_0, window_bounds = array<i64: 2, 4, 16>}, {pipeline_mode = #tpu.pipeline_mode<synchronous>, transform_indices = @transform_1, window_bounds = array<i64: 4, 4>}, {pipeline_mode = #tpu.pipeline_mode<synchronous>, transform_indices = @transform_2, window_bounds = array<i64: 4, 4>}, {pipeline_mode = #tpu.pipeline_mode<synchronous>, transform_indices = @transform_3, window_bounds = array<i64: 4, 1>}, {transform_indices = @transform_4, window_bounds = array<i64: 2, 4, 16>}]} {
    %c0_i32 = arith.constant 0 : i32
    %0 = arith.cmpi eq, %arg1, %c0_i32 : i32
    %1 = arith.extui %0 : i1 to i32
    %c0_i32_0 = arith.constant 0 : i32
    %2 = arith.cmpi ne, %1, %c0_i32_0 : i32
    scf.if %2 {
      %cst_23 = arith.constant 0.000000e+00 : f32
      %36 = vector.broadcast %cst_23 : f32 to vector<2x4x2xf32>
      %c0_24 = arith.constant 0 : index
      %c0_25 = arith.constant 0 : index
      %c0_26 = arith.constant 0 : index
      %37 = vector.load %arg7[%c0_24, %c0_25, %c0_26] : memref<2x4x2xf32, #tpu.memory_space<vmem>>, vector<2x4x2xf32>
      tpu.vector_store %arg7[%c0_24, %c0_25, %c0_26], %36 {strides = array<i32>} : memref<2x4x2xf32, #tpu.memory_space<vmem>>, vector<2x4x2xf32>,
    } else {
    }
    %c0 = arith.constant 0 : index
    %c0_1 = arith.constant 0 : index
    %c0_2 = arith.constant 0 : index
    %3 = vector.load %arg2[%c0, %c0_1, %c0_2] : memref<2x4x16xf32, #tpu.memory_space<vmem>>, vector<2x4x16xf32>
    %c0_3 = arith.constant 0 : index
    %c0_4 = arith.constant 0 : index
    %c0_5 = arith.constant 0 : index
    %4 = vector.load %arg7[%c0_3, %c0_4, %c0_5] : memref<2x4x2xf32, #tpu.memory_space<vmem>>, vector<2x4x2xf32>
    %5 = tpu.concatenate %4, %3 in 2 : vector<2x4x2xf32>, vector<2x4x16xf32> -> vector<2x4x18xf32>
    %6 = vector.extract_strided_slice %5 {offsets = [0, 0, 0], sizes = [2, 4, 16], strides = [1, 1, 1]} : vector<2x4x18xf32> to vector<2x4x16xf32>
    %7 = vector.extract_strided_slice %5 {offsets = [0, 0, 16], sizes = [2, 4, 2], strides = [1, 1, 1]} : vector<2x4x18xf32> to vector<2x4x2xf32>
    %c0_6 = arith.constant 0 : index
    %c0_7 = arith.constant 0 : index
    %c0_8 = arith.constant 0 : index
    %8 = vector.load %arg7[%c0_6, %c0_7, %c0_8] : memref<2x4x2xf32, #tpu.memory_space<vmem>>, vector<2x4x2xf32>
    tpu.vector_store %arg7[%c0_6, %c0_7, %c0_8], %7 {strides = array<i32>} : memref<2x4x2xf32, #tpu.memory_space<vmem>>, vector<2x4x2xf32>,
    %c0_9 = arith.constant 0 : index
    %c0_10 = arith.constant 0 : index
    %9 = vector.load %arg3[%c0_9, %c0_10] : memref<4x4xf32, #tpu.memory_space<vmem>>, vector<4x4xf32>
    %c0_11 = arith.constant 0 : index
    %c0_12 = arith.constant 0 : index
    %10 = vector.load %arg4[%c0_11, %c0_12] : memref<4x4xf32, #tpu.memory_space<vmem>>, vector<4x4xf32>
    %c0_13 = arith.constant 0 : index
    %c0_14 = arith.constant 0 : index
    %11 = vector.load %arg5[%c0_13, %c0_14] : memref<4x1xf32, #tpu.memory_space<vmem>>, vector<4x1xf32>
    %12 = vector.extract_strided_slice %6 {offsets = [0, 0, 0], sizes = [1, 4, 16], strides = [1, 1, 1]} : vector<2x4x16xf32> to vector<1x4x16xf32>
    %13 = vector.shape_cast %12 : vector<1x4x16xf32> to vector<4x16xf32>
    %cst = arith.constant dense<0.000000e+00> : vector<4x16xf32>
    %14 = tpu.matmul %9, %13, %cst {dimension_numbers = #tpu.dot_dimension_numbers<[1], [0], [0], [1], [0, 0, 1, 1], [], []>} : vector<4x4xf32>, vector<4x16xf32>, vector<4x16xf32> -> vector<4x16xf32>
    %15 = vector.extract_strided_slice %3 {offsets = [0, 0, 0], sizes = [1, 4, 16], strides = [1, 1, 1]} : vector<2x4x16xf32> to vector<1x4x16xf32>
    %16 = vector.shape_cast %15 : vector<1x4x16xf32> to vector<4x16xf32>
    %cst_15 = arith.constant dense<0.000000e+00> : vector<4x16xf32>
    %17 = tpu.matmul %10, %16, %cst_15 {dimension_numbers = #tpu.dot_dimension_numbers<[1], [0], [0], [1], [0, 0, 1, 1], [], []>} : vector<4x4xf32>, vector<4x16xf32>, vector<4x16xf32> -> vector<4x16xf32>
    %18 = arith.addf %14, %17 : vector<4x16xf32>
    %19 = vector.broadcast %11 : vector<4x1xf32> to vector<4x16xf32>
    %20 = arith.addf %18, %19 : vector<4x16xf32>
    %c0_16 = arith.constant 0 : index
    %c0_17 = arith.constant 0 : index
    %c0_18 = arith.constant 0 : index
    %21 = vector.load %arg6[%c0_16, %c0_17, %c0_18] : memref<2x4x16xf32, #tpu.memory_space<vmem>>, vector<1x4x16xf32>
    %22 = vector.shape_cast %21 : vector<1x4x16xf32> to vector<4x16xf32>
    %23 = vector.shape_cast %20 : vector<4x16xf32> to vector<1x4x16xf32>
    tpu.vector_store %arg6[%c0_16, %c0_17, %c0_18], %23 {strides = array<i32>} : memref<2x4x16xf32, #tpu.memory_space<vmem>>, vector<1x4x16xf32>,
    %24 = vector.extract_strided_slice %6 {offsets = [1, 0, 0], sizes = [1, 4, 16], strides = [1, 1, 1]} : vector<2x4x16xf32> to vector<1x4x16xf32>
    %25 = vector.shape_cast %24 : vector<1x4x16xf32> to vector<4x16xf32>
    %cst_19 = arith.constant dense<0.000000e+00> : vector<4x16xf32>
    %26 = tpu.matmul %9, %25, %cst_19 {dimension_numbers = #tpu.dot_dimension_numbers<[1], [0], [0], [1], [0, 0, 1, 1], [], []>} : vector<4x4xf32>, vector<4x16xf32>, vector<4x16xf32> -> vector<4x16xf32>
    %27 = vector.extract_strided_slice %3 {offsets = [1, 0, 0], sizes = [1, 4, 16], strides = [1, 1, 1]} : vector<2x4x16xf32> to vector<1x4x16xf32>
    %28 = vector.shape_cast %27 : vector<1x4x16xf32> to vector<4x16xf32>
    %cst_20 = arith.constant dense<0.000000e+00> : vector<4x16xf32>
    %29 = tpu.matmul %10, %28, %cst_20 {dimension_numbers = #tpu.dot_dimension_numbers<[1], [0], [0], [1], [0, 0, 1, 1], [], []>} : vector<4x4xf32>, vector<4x16xf32>, vector<4x16xf32> -> vector<4x16xf32>
    %30 = arith.addf %26, %29 : vector<4x16xf32>
    %31 = vector.broadcast %11 : vector<4x1xf32> to vector<4x16xf32>
    %32 = arith.addf %30, %31 : vector<4x16xf32>
    %c1 = arith.constant 1 : index
    %c0_21 = arith.constant 0 : index
    %c0_22 = arith.constant 0 : index
    %33 = vector.load %arg6[%c1, %c0_21, %c0_22] : memref<2x4x16xf32, #tpu.memory_space<vmem>>, vector<1x4x16xf32>
    %34 = vector.shape_cast %33 : vector<1x4x16xf32> to vector<4x16xf32>
    %35 = vector.shape_cast %32 : vector<4x16xf32> to vector<1x4x16xf32>
    tpu.vector_store %arg6[%c1, %c0_21, %c0_22], %35 {strides = array<i32>} : memref<2x4x16xf32, #tpu.memory_space<vmem>>, vector<1x4x16xf32>,
    return
  }
  func.func @transform_0(%arg0: i32, %arg1: i32) -> (i32, i32, i32) {
    %c0_i32 = arith.constant 0 : i32
    %c0_i32_0 = arith.constant 0 : i32
    return %arg0, %c0_i32, %arg1 : i32, i32, i32
  }
  func.func @transform_1(%arg0: i32, %arg1: i32) -> (i32, i32) {
    %c0_i32 = arith.constant 0 : i32
    %c0_i32_0 = arith.constant 0 : i32
    %c0_i32_1 = arith.constant 0 : i32
    return %c0_i32, %c0_i32_0 : i32, i32
  }
  func.func @transform_2(%arg0: i32, %arg1: i32) -> (i32, i32) {
    %c0_i32 = arith.constant 0 : i32
    %c0_i32_0 = arith.constant 0 : i32
    %c0_i32_1 = arith.constant 0 : i32
    return %c0_i32, %c0_i32_0 : i32, i32
  }
  func.func @transform_3(%arg0: i32, %arg1: i32) -> (i32, i32) {
    %c0_i32 = arith.constant 0 : i32
    %c0_i32_0 = arith.constant 0 : i32
    %c0_i32_1 = arith.constant 0 : i32
    return %c0_i32, %c0_i32_0 : i32, i32
  }
  func.func @transform_4(%arg0: i32, %arg1: i32) -> (i32, i32, i32) {
    %c0_i32 = arith.constant 0 : i32
    %c0_i32_0 = arith.constant 0 : i32
    return %arg0, %c0_i32, %arg1 : i32, i32, i32
  }
}

</mosaic_0001>

<bundles_post_ra>
// kernel: tpu_custom_call.1
= control target key start
LH: loop header
LB: loop body
LE: loop exit
PB: predicated region body
PF: predicated region fallthrough
CT: control target
= control target key end

     0   :  { %9 = vsyncpa [#allocation4], 0  ;;  %s576_s0 = inlined_call_operand.hbm [shape: f32[2,4,16], index: 0, kind: input, shape index: {}]   ;;  %s577_s1 = inlined_call_operand.vmem [shape: f32[4,4], index: 1, kind: input, shape index: {}]   ;;  %s578_s2 = inlined_call_operand.vmem [shape: f32[4,4], index: 2, kind: input, shape index: {}]   ;;  %s579_s3 = inlined_call_operand.vmem [shape: f32[4,1], index: 3, kind: input, shape index: {}]   ;;  %s580_s4 = inlined_call_operand.hbm [shape: f32[2,4,16], index: 4, kind: output, shape index: {}]  }
   0x1   :  { %10 = vsyncpa [#allocation5], 0  ;;  %s487_s15 = smov [#allocation3]   ;;  %s439_s19 = scalar_lea.hbm %s576_s0, 128 }
   0x2   :  { %s16_s16 = sshll.u32 %s487_s15, 4  ;;  %p440_p0 = scmp.ne.s32.totalorder %s576_s0, %s439_s19  ;;  %s17_s16 = int_to_ptr.vmem [resolvable:$true] %s16_s16 }
   0x3   :  { %p443_p1 = scmp.lt.u32.totalorder %s439_s19, %s576_s0 }
   0x5   :  { %p445_p2 = pnand %p443_p1, %p440_p0 }
   0x7   :  { %448 = shalt.err (!%p445_p2)
}
   0x8   :  { %s449_s24 = scalar_lea.vmem %s17_s16, 128  ;;  %p454_p4 = scmp.lt.s32.totalorder %s17_s16, %s17_s16 }
   0x9   :  { %p450_p3 = scmp.ne.s32.totalorder %s17_s16, %s449_s24  ;;  %p455_p5 = scmp.lt.s32.totalorder %s449_s24, %s449_s24 }
   0xb   :  { %p456_p6 = por %p455_p5, %p454_p4 }
   0xd   :  { %p457_p7 = pnand %p456_p6, %p450_p3 }
   0xf   :  { %460 = shalt.err (!%p457_p7)
}
  0x10   :  { %s488_s25 = smov 64   ;;  %s489_s26 = smov 4  }
  0x11   :  { %22 = dma.hbm_to_vmem [thread:$0]  %s576_s0, 128, %s17_s16, [#allocation4], %s488_s25, %s488_s25, %s489_s26  }
  0x12   :  { %483 = dma.done.wait [#allocation4], 128  }
  0x13   :  { %484 = vsyncadd [#allocation4], 4294967168  ;;  %vm36_vm0 = vcmask 11264   ;;  %v490_v0 = vmov 0   ;;  %v491_v1 = vmov 0.0   ;;  %vm492_vm1 = vmmov 0  }
  0x14   :  { %437 = vset.pattern.permute.xlu1 %v490_v0  ;;  %413 = vmatprep.subr.mxu1 %v491_v1  ;;  %37 = vst.msk [vmem:[#allocation2] sm:$0xf] %vm36_vm0, %v491_v1  ;;  %38 = vst.msk [vmem:[#allocation2 + $0x4] sm:$0xf] %vm36_vm0, %v491_v1  ;;  %vm72_vm2 = vcmask 1043456   ;;  %vm68_vm3 = vcmask 31744  }
  0x15   :  { %408 = vmatprep.subr.mxu0 %v491_v1  ;;  %410 = vmatprep.mubr.msk.f32.mxu0 %vm492_vm1, %v491_v1  ;;  %v39_v2 = vld [vmem:[#allocation3] sm:$0xf]  ;;  %v67_v3 = vld [vmem:[%s579_s3] sm:$0xf]  ;;  %s493_s30 = smov 2   ;;  %vm51_vm4 = vcmask 15360  }
  0x16   :  { %415 = vmatprep.mubr.msk.f32.mxu1 %vm492_vm1, %v491_v1  ;;  %438 = vset.pattern.permute.xlu0 %v490_v0  ;;  %v66_v4 = vld [vmem:[%s578_s2] sm:$0xf]  ;;  %v40_v5 = vld [vmem:[#allocation3 + $0x4] sm:$0xf]  ;;  %s494_s2 = smov 112   ;;  %vm226_vm5 = vcmask 125952  }
  0x17   :  { %45 = vrot.lane.b32.xlu0 %v39_v2, %s493_s30  ;;  %222 = vperm.xlu1 %437, %v67_v3   ;;  %v65_v8 = vld [vmem:[%s577_s1] sm:$0xf]  ;;  %s495_s1 = smov [#allocation6]  }
  0x18   :  { %409 = vmatpush3.msk.msra.mxu0 %vm72_vm2, %v39_v2  ;;  %s380_s8 = sshll.u32 %s495_s1, 4  ;;  %s381_s8 = int_to_ptr.vmem [resolvable:$true] %s380_s8 }
  0x19   :  { %411 = vmatmul.mubr.msk.f32.vlgmr.msra.gmra.mrb[0].mxu0 %vm68_vm3, %v66_v4  ;;  %418 = vmatprep.subr.mxu0 %v491_v1  ;;  %s461_s9 = scalar_lea.vmem %s381_s8, 128  ;;  %p466_p9 = scmp.lt.s32.totalorder %s381_s8, %s381_s8 }
  0x1a   :  { %419 = vmatpush3.msk.msra.mxu0 %vm72_vm2, %v40_v5  ;;  %420 = vmatprep.mubr.msk.f32.mxu0 %vm492_vm1, %v491_v1  ;;  %p462_p8 = scmp.ne.s32.totalorder %s381_s8, %s461_s9  ;;  %p467_p10 = scmp.lt.s32.totalorder %s461_s9, %s461_s9 }
  0x1b   :  { %47 = vrot.lane.b32.xlu0 %v40_v5, %s493_s30  ;;  %v41_v6 = vld [vmem:[#allocation2] sm:$0xf]  ;;  %v42_v10 = vld [vmem:[#allocation2 + $0x4] sm:$0xf] }
  0x1c   :  { %p468_p11 = por %p467_p10, %p466_p9 }
  0x1d   :  { %421 = vmatmul.mubr.msk.f32.vlgmr.msra.gmra.mrb[2].mxu0 %vm68_vm3, %v66_v4 }
  0x1e   :  { %p469_p12 = pnand %p468_p11, %p462_p8 }
  0x89   :  { %v46_v7 = vpop.permute.xlu0 %45 }
  0x8a   :  { %v52_v9 = vsel %vm51_vm4, %v41_v6, %v46_v7 }
  0x8b   :  { %56 = vrot.lane.b32.xlu1 %v52_v9, %s494_s2  ;;  %414 = vmatpush3.msk.msra.mxu1 %vm72_vm2, %v52_v9 }
  0x8c   :  { %416 = vmatmul.mubr.msk.f32.vlgmr.msra.gmra.mrb[0].mxu1 %vm68_vm3, %v65_v8  ;;  %423 = vmatprep.subr.mxu1 %v491_v1 }
  0x8d   :  { %v48_v11 = vpop.permute.xlu0 %47  ;;  %425 = vmatprep.mubr.msk.f32.mxu1 %vm492_vm1, %v491_v1 }
  0x8e   :  { %v53_v12 = vsel %vm51_vm4, %v42_v10, %v48_v11 }
  0x8f   :  { %58 = vrot.lane.b32.xlu0 %v53_v12, %s494_s2  ;;  %424 = vmatpush3.msk.msra.mxu1 %vm72_vm2, %v53_v12 }
  0x90   :  { %426 = vmatmul.mubr.msk.f32.vlgmr.msra.gmra.mrb[2].mxu1 %vm68_vm3, %v65_v8 }
  0x96   :  { %v223_v17 = vpop.permute.xlu1 %222 }
  0xec   :  { %v141_v13 = vpop.f32.mrb[0].mxu0 }
  0xed   :  { %v412_v14 = vpop.f32.mrb[1].mxu0 }
  0xf0   :  { %v296_v15 = vpop.f32.mrb[2].mxu0 }
  0xf1   :  { %v422_v16 = vpop.f32.mrb[3].mxu0 }
  0xfd   :  { %v57_v18 = vpop.permute.xlu1 %56 }
  0xfe   :  { %63 = vst.msk [vmem:[#allocation2] sm:$0xf] %vm36_vm0, %v57_v18 }
 0x101   :  { %v59_v19 = vpop.permute.xlu0 %58 }
 0x102   :  { %64 = vst.msk [vmem:[#allocation2 + $0x4] sm:$0xf] %vm36_vm0, %v59_v19 }
 0x15f   :  { %v216_v20 = vpop.f32.mrb[0].mxu1 }
 0x160   :  { %v217_v21 = vadd.f32 %v216_v20, %v141_v13  ;;  %v417_v22 = vpop.f32.mrb[1].mxu1 }
 0x162   :  { %v225_v23 = vadd.f32 %v223_v17, %v217_v21 }
 0x163   :  { %v368_v24 = vpop.f32.mrb[2].mxu1 }
 0x164   :  { %v369_v25 = vadd.f32 %v368_v24, %v296_v15  ;;  %v427_v26 = vpop.f32.mrb[3].mxu1  ;;  %227 = vst.msk [vmem:[#allocation6] sm:$0xf] %vm226_vm5, %v225_v23 }
 0x166   :  { %v372_v27 = vadd.f32 %v369_v25, %v223_v17 }
 0x168   :  { %374 = vst.msk [vmem:[#allocation6 + $0x4] sm:$0xf] %vm226_vm5, %v372_v27 }
 0x169   :  { %472 = shalt.err (!%p469_p12)
}
 0x16a   :  { %s473_s12 = scalar_lea.hbm %s580_s4, 128 }
 0x16b   :  { %p474_p13 = scmp.ne.s32.totalorder %s580_s4, %s473_s12  ;;  %p477_p0 = scmp.lt.u32.totalorder %s473_s12, %s580_s4 }
 0x16d   :  { %p479_p1 = pnand %p477_p0, %p474_p13 }
 0x16f   :  { %482 = shalt.err (!%p479_p1)
}
 0x170   :  { %386 = dma.vmem_to_hbm [thread:$0]  %s381_s8, 128, %s580_s4, [#allocation5], %s488_s25, %s488_s25, %s489_s26  }
 0x171   :  { %485 = dma.done.wait [#allocation5], 128  }
 0x172   :  { %486 = vsyncadd [#allocation5], 4294967168 }
 0x173   :  { %390 = vsyncpa [#allocation4], 1 }
 0x174   :  { %391 = vsyncpa [#allocation5], 1 }

</bundles_post_ra>
